<compile_context>
chip_gen: v7x
topology: tpu7x:2x2x1
jax: 0.10.0
libtpu: 0.0.40
codegen_flags: <defaults>
</compile_context>

<pallas_src>
import jax
import jax.numpy as jnp
from jax.experimental import pallas as pl
from jax.experimental.pallas import tpu as pltpu

C_IN = 1
C_OUT = 8


def _round_up(x, m):
    return (x + m - 1) // m * m


def _target_tile_lanes():
    # v7x (3.2 TB/s HBM) drains small tiles faster than per-step overhead, so
    # use 128K-lane tiles there; 64K lanes elsewhere (double-buffered ~5 MiB,
    # comfortably inside v5e's 16 MiB default scoped VMEM as well).
    try:
        kind = jax.devices()[0].device_kind.lower()
    except Exception:
        kind = ""
    return 131072 if "v7" in kind else 65536


def fused_affine_relu_kernel(x_ref, wb_ref, o_ref):
    # x_ref : (1, TILE_P)    pixels lane-dense (single input channel)
    # wb_ref: (2, C_OUT, 1)  [0] = folded weights, [1] = folded bias
    # o_ref : (C_OUT, TILE_P)
    w = wb_ref[0]  # (C_OUT, 1)
    b = wb_ref[1]  # (C_OUT, 1)
    # (1,T) x (8,1) broadcast-FMA + relu; Mosaic keeps the broadcast operands
    # in replicated layouts so the body is a vld/vfma/vmax/vst stream.
    o_ref[...] = jnp.maximum(x_ref[...] * w + b, 0.0)


@jax.jit
def model_forward(x_nchw, w1, b1, w2, b2, w3, b3):
    """x_nchw: (N, 1, H, W) f32.  w*: (Cin, Cout), b*: (Cout,).
    Returns (N, 8, H+2, W+2) f32 (v1's spatial grid)."""
    N, Cin, H, W = x_nchw.shape
    assert Cin == C_IN
    Hp, Wp = H + 2, W + 2
    P_img = Hp * Wp

    target = _target_tile_lanes()
    full = _round_up(P_img, 128)
    if full <= target:
        if N == 1 and full >= 256:
            # Split the single image into 2 pixel blocks so the grid has >=2
            # parallel steps (megacore) and the pipeline can overlap.
            tile_p = _round_up(-(-full // 2), 128)
        else:
            tile_p = full
    else:
        tile_p = target
    num_pb = pl.cdiv(P_img, tile_p)

    # Fold the whole (linear) conv chain into one affine map — exact up to fp32
    # reordering.
    eye = jnp.eye(C_OUT, dtype=jnp.float32)
    M = eye + w2 + w3 + w2 @ w3
    w_eff = (w1 @ M).reshape(C_OUT, 1)                           # (8, 1)
    b_eff = (b1 @ M + b2 + b2 @ w3 + 2.0 * b3).reshape(C_OUT, 1)  # (8, 1)
    wb = jnp.stack([w_eff, b_eff], axis=0)                        # (2, 8, 1)

    # (N,1,H,W) -> drop unit channel (free) -> zero-pad spatially (conv1's
    # padding) -> flatten pixels onto the lane axis.  No lane-tail padding:
    # the ragged last block is handled by Pallas masked loads/stores.
    xs = x_nchw[:, 0]                                             # (N, H, W)
    xp = jnp.pad(xs, ((0, 0), (1, 1), (1, 1)))                    # (N, Hp, Wp)
    x_flat = xp.reshape(N, 1, P_img)

    out = pl.pallas_call(
        fused_affine_relu_kernel,
        out_shape=jax.ShapeDtypeStruct((N, C_OUT, P_img), jnp.float32),
        grid_spec=pltpu.PrefetchScalarGridSpec(
            num_scalar_prefetch=0,
            grid=(N, num_pb),
            in_specs=[
                pl.BlockSpec((None, 1, tile_p), lambda n, i: (n, 0, i)),
                pl.BlockSpec((2, C_OUT, 1), lambda n, i: (0, 0, 0)),
            ],
            out_specs=pl.BlockSpec((None, C_OUT, tile_p), lambda n, i: (n, 0, i)),
        ),
        compiler_params=pltpu.CompilerParams(
            dimension_semantics=("parallel", "parallel"),
            # Explicit headroom for the big-tile configs; well under physical
            # VMEM on v5e/v6e (128 MiB) and v7x (64 MiB).
            vmem_limit_bytes=48 * 1024 * 1024,
        ),
    )(x_flat, wb)

    # Channel-major result maps straight onto NCHW; reshape is free.
    return out.reshape(N, C_OUT, Hp, Wp)


def reference_forward(x_nchw, w1, b1, w2, b2, w3, b3):
    """Pure-JAX reference: real padded 1x1 convs + center-crop alignment."""

    def conv1x1(x, w_io, b):  # w_io: (Cin, Cout)
        w_oihw = jnp.transpose(w_io)[:, :, None, None]  # (Cout, Cin, 1, 1)
        y = jax.lax.conv_general_dilated(
            x, w_oihw, window_strides=(1, 1), padding=((1, 1), (1, 1)),
            dimension_numbers=("NCHW", "OIHW", "NCHW"))
        return y + b[None, :, None, None]

    v1 = conv1x1(x_nchw, w1, b1)   # (N,8,H+2,W+2)
    v2 = conv1x1(v1, w2, b2)       # (N,8,H+4,W+4)
    v3 = conv1x1(v1, w3, b3)       # (N,8,H+4,W+4)
    v4 = conv1x1(v2, w3, b3)       # (N,8,H+6,W+6)
    v2c = v2[:, :, 1:-1, 1:-1]
    v3c = v3[:, :, 1:-1, 1:-1]
    v4c = v4[:, :, 2:-2, 2:-2]
    return jnp.maximum(v1 + v2c + v3c + v4c, 0.0)


if __name__ == "__main__":
    key = jax.random.PRNGKey(0)
    kx, k1, k2, k3, k4, k5, k6 = jax.random.split(key, 7)

    # small shapes consistent with the module (single input channel)
    N, H, W = 2, 16, 16
    x = jax.random.normal(kx, (N, C_IN, H, W), dtype=jnp.float32)

    # deterministic parameters; stored as (Cin, Cout) for the folded affine map
    w1 = jax.random.normal(k1, (C_IN, C_OUT), dtype=jnp.float32) * 0.5
    b1 = jax.random.normal(k2, (C_OUT,), dtype=jnp.float32) * 0.1
    w2 = jax.random.normal(k3, (C_OUT, C_OUT), dtype=jnp.float32) * 0.3
    b2 = jax.random.normal(k4, (C_OUT,), dtype=jnp.float32) * 0.1
    w3 = jax.random.normal(k5, (C_OUT, C_OUT), dtype=jnp.float32) * 0.3
    b3 = jax.random.normal(k6, (C_OUT,), dtype=jnp.float32) * 0.1

    out = jax.block_until_ready(model_forward(x, w1, b1, w2, b2, w3, b3))
    ref = reference_forward(x, w1, b1, w2, b2, w3, b3)
    assert out.shape == (N, C_OUT, H + 2, W + 2), out.shape
    assert jnp.allclose(out, ref, atol=1e-4, rtol=1e-4), float(jnp.abs(out - ref).max())

    # also exercise the original module's input shape (1, 1, 64, 64):
    # N==1 path splits pixels into 2 blocks (ragged last block, megacore-friendly)
    x2 = jax.random.normal(kx, (1, C_IN, 64, 64), dtype=jnp.float32)
    out2 = jax.block_until_ready(model_forward(x2, w1, b1, w2, b2, w3, b3))
    ref2 = reference_forward(x2, w1, b1, w2, b2, w3, b3)
    assert out2.shape == (1, C_OUT, 66, 66), out2.shape
    assert jnp.allclose(out2, ref2, atol=1e-4, rtol=1e-4), float(jnp.abs(out2 - ref2).max())

    print("KERNEL_OK")
</pallas_src>

<mosaic_0001>
module attributes {stable_mosaic.version = 11 : i64} {
  func.func @fused_affine_relu_kernel(%arg0: i32, %arg1: i32, %arg2: memref<1x1x384xf32, #tpu.memory_space<vmem>>, %arg3: memref<2x8x1xf32, #tpu.memory_space<vmem>>, %arg4: memref<1x8x384xf32, #tpu.memory_space<vmem>>) attributes {dimension_semantics = [#tpu.dimension_semantics<parallel>, #tpu.dimension_semantics<parallel>], iteration_bounds = array<i64: 2, 1>, scalar_prefetch = 0 : i64, scratch_operands = 0 : i64, tpu.core_type = #tpu.core_type<tc>, window_params = [{transform_indices = @transform_0, window_bounds = array<i64: 1, 1, 384>}, {pipeline_mode = #tpu.pipeline_mode<synchronous>, transform_indices = @transform_1, window_bounds = array<i64: 2, 8, 1>}, {transform_indices = @transform_2, window_bounds = array<i64: 1, 8, 384>}]} {
    %c0 = arith.constant 0 : index
    %c0_0 = arith.constant 0 : index
    %c0_1 = arith.constant 0 : index
    %0 = vector.load %arg3[%c0, %c0_0, %c0_1] : memref<2x8x1xf32, #tpu.memory_space<vmem>>, vector<1x8x1xf32>
    %1 = vector.shape_cast %0 : vector<1x8x1xf32> to vector<8x1xf32>
    %c1 = arith.constant 1 : index
    %c0_2 = arith.constant 0 : index
    %c0_3 = arith.constant 0 : index
    %2 = vector.load %arg3[%c1, %c0_2, %c0_3] : memref<2x8x1xf32, #tpu.memory_space<vmem>>, vector<1x8x1xf32>
    %3 = vector.shape_cast %2 : vector<1x8x1xf32> to vector<8x1xf32>
    %c0_4 = arith.constant 0 : index
    %c0_5 = arith.constant 0 : index
    %c0_6 = arith.constant 0 : index
    %4 = vector.load %arg2[%c0_4, %c0_5, %c0_6] : memref<1x1x384xf32, #tpu.memory_space<vmem>>, vector<1x1x384xf32>
    %5 = vector.shape_cast %4 : vector<1x1x384xf32> to vector<1x384xf32>
    %6 = vector.broadcast %5 : vector<1x384xf32> to vector<8x384xf32>
    %7 = vector.broadcast %1 : vector<8x1xf32> to vector<8x384xf32>
    %8 = arith.mulf %6, %7 : vector<8x384xf32>
    %9 = vector.broadcast %3 : vector<8x1xf32> to vector<8x384xf32>
    %10 = arith.addf %8, %9 : vector<8x384xf32>
    %cst = arith.constant 0.000000e+00 : f32
    %11 = vector.broadcast %cst : f32 to vector<8x384xf32>
    %12 = arith.maximumf %10, %11 : vector<8x384xf32>
    %c0_7 = arith.constant 0 : index
    %c0_8 = arith.constant 0 : index
    %c0_9 = arith.constant 0 : index
    %13 = vector.load %arg4[%c0_7, %c0_8, %c0_9] : memref<1x8x384xf32, #tpu.memory_space<vmem>>, vector<1x8x384xf32>
    %14 = vector.shape_cast %13 : vector<1x8x384xf32> to vector<8x384xf32>
    %15 = vector.shape_cast %12 : vector<8x384xf32> to vector<1x8x384xf32>
    tpu.vector_store %arg4[%c0_7, %c0_8, %c0_9], %15 {strides = array<i32>} : memref<1x8x384xf32, #tpu.memory_space<vmem>>, vector<1x8x384xf32>,
    return
  }
  func.func @transform_0(%arg0: i32, %arg1: i32) -> (i32, i32, i32) {
    %c0_i32 = arith.constant 0 : i32
    %c0_i32_0 = arith.constant 0 : i32
    return %arg0, %c0_i32, %arg1 : i32, i32, i32
  }
  func.func @transform_1(%arg0: i32, %arg1: i32) -> (i32, i32, i32) {
    %c0_i32 = arith.constant 0 : i32
    %c0_i32_0 = arith.constant 0 : i32
    %c0_i32_1 = arith.constant 0 : i32
    %c0_i32_2 = arith.constant 0 : i32
    return %c0_i32, %c0_i32_0, %c0_i32_1 : i32, i32, i32
  }
  func.func @transform_2(%arg0: i32, %arg1: i32) -> (i32, i32, i32) {
    %c0_i32 = arith.constant 0 : i32
    %c0_i32_0 = arith.constant 0 : i32
    return %arg0, %c0_i32, %arg1 : i32, i32, i32
  }
}

</mosaic_0001>

<bundles_post_ra>
// kernel: model_forward.1
= control target key start
LH: loop header
LB: loop body
LE: loop exit
PB: predicated region body
PF: predicated region fallthrough
CT: control target
= control target key end

     0   :  { %s383_s9 = smov 0   ;;  %s385_s10 = smov 0   ;;  %s422_s0 = inlined_call_operand.vmem [shape: f32[2,1,324], index: 0, kind: input, shape index: {}]   ;;  %s423_s1 = inlined_call_operand.vmem [shape: f32[2,8,1], index: 1, kind: input, shape index: {}]   ;;  %s424_s2 = inlined_call_operand.vmem [shape: f32[2,8,324], index: 2, kind: output, shape index: {}]  }
   0x1   :  { %s387_s11 = smov 0  }
   0x2 LB: > { %s24_s12 = sadd.s32 1, %s361_s10  ;;  %p310_p0 = scmp.ge.s32.totalorder %s365_s11, 1  ;;  %s365_s11 = sphi %s387_s11, %s12_s11   ;;  %s361_s10 = sphi %s385_s10, %s426_s10   ;;  %s357_s9 = sphi %s383_s9, %s425_s9  }
   0x3   : > { %p26_p1 = scmp.ge.s32.totalorder %s24_s12, 2  ;;  %p132_p2 = scmp.lt.s32.totalorder %s365_s11, 3 }
   0x5   : > { %s428_s12 = smov (%p26_p1, %s24_s12), 0  ;;  %p133_p3 = pnand %p310_p0, %p132_p2 }
   0x6   : > { %v180_v0 = vld [vmem:[%s423_s1] sm:$0xff] (!%p133_p3)  ;;  %v367_v1 = vmov (!%p133_p3), 0   ;;  %v312_v2 = vld [vmem:[%s423_s1 + $0x8] sm:$0xff] (!%p133_p3)  ;;  %p162_p4 = scmp.lt.s32.totalorder (!%p133_p3), %s357_s9, 1  ;;  %v185_v3 = vlaneseq (!%p133_p3) }
   0x7   : > { %136 = sbr.rel (%p133_p3) target bundleno = 146 (0x92), region = 28  ;;  %342 = vset.pattern.permute.xlu0 (!%p133_p3), %v367_v1 }
   0x8   : > { %202 = vperm.xlu0 (!%p133_p3), %342, %v180_v0   ;;  %v186_v4 = vshrl.u32 (!%p133_p3), %v185_v3, 7 }
   0xa   : > { %v187_v5 = vsub.s32 (!%p133_p3), 0, %v186_v4  ;;  %v191_v6 = vsub.s32 (!%p133_p3), 1, %v186_v4  ;;  %v195_v7 = vsub.s32 (!%p133_p3), 2, %v186_v4 }
   0xc   : > { %210 = vperm.xlu0 (!%p133_p3), %342, %v312_v2  }
   0xe   : > { %s430_s9 = smov (!%p162_p4, %s357_s9), 1 }
   0xf   : > { %s315_s17 = smul.u32 3, %s430_s9 }
  0x10   : > { %s316_s21 = smul.u32 24, %s430_s9 }
  0x11   : > { %s168_s20 = scalar_lea.vmem %s422_s0, %s315_s17 }
  0x12   : > { %v183_v8 = vld [vmem:[%s168_s20] sm:$0x7]  ;;  %s178_s24 = scalar_lea.vmem %s424_s2, %s316_s21 }
  0x13   : > { %v188_v9 = vrot.slane %v183_v8, %v187_v5  ;;  %v192_v10 = vrot.slane %v183_v8, %v191_v6  ;;  %v196_v11 = vrot.slane %v183_v8, %v195_v7 }
  0x87   : > { %v203_v12 = vpop.permute.xlu0 %202 }
  0x88   : > { %v205_v13 = vmul.f32 %v203_v12, %v188_v9  ;;  %v206_v14 = vmul.f32 %v203_v12, %v192_v10  ;;  %v207_v15 = vmul.f32 %v203_v12, %v196_v11 }
  0x8b   : > { %v211_v16 = vpop.permute.xlu0 %210 }
  0x8c   : > { %v213_v17 = vadd.f32 %v211_v16, %v205_v13  ;;  %v214_v18 = vadd.f32 %v211_v16, %v206_v14  ;;  %v215_v19 = vadd.f32 %v211_v16, %v207_v15 }
  0x8e   : > { %v216_v20 = vmax.f32 %v213_v17, 0.0  ;;  %v217_v21 = vmax.f32 %v214_v18, 0.0  ;;  %v218_v22 = vmax.f32 %v215_v19, 0.0 }
  0x90   : > { %219 = vst [vmem:[%s178_s24] sm:$0xff] %v216_v20  ;;  %220 = vst [vmem:[%s178_s24 + $0x8] sm:$0xff] %v217_v21 }
  0x91   : > { %221 = vst [vmem:[%s178_s24 + $0x10] sm:$0xff] %v218_v22 }
  0x92 PF: > { %s12_s11 = sadd.s32 1, %s365_s11   ;;  %s425_s9 = smov %s361_s10 }
  0x93   : > { %p9_p5 = scmp.ge.s32.totalorder %s12_s11, 4   ;;  %s426_s10 = smov %s428_s12 }
  0x95   :  { %11 = sbr.rel (!%p9_p5) target bundleno = 2 (0x2), region = 59 }

</bundles_post_ra>
